<compile_context>
chip_gen: v7x
topology: tpu7x:2x2x1
jax: 0.10.0
libtpu: 0.0.40
codegen_flags: <defaults>
</compile_context>

<pallas_src>
import functools
import math

import jax
import jax.numpy as jnp
from jax.experimental import pallas as pl
from jax.experimental.pallas import tpu as pltpu


_TN_TARGET = 2048   # vocab (lane) tile target; multiple of 256 for v6e/v7x MXU
_TM_TARGET = 256    # sample (M/sublane) tile target; full MXU rows on v6e/v7x


def _round_up(x, m):
    return ((x + m - 1) // m) * m


def _padded_vocab_dims(V, E):
    """Padded (Vp, Ep, TN) consistent between param prep and forward."""
    Ep = _round_up(max(E, 1), 128)
    Vp = _round_up(max(V, 1), 128)
    TN = min(_TN_TARGET, Vp)
    Vp = _round_up(Vp, TN)
    return Vp, Ep, TN


def prepare_skipgram_params(emb_weight, out_weight, param_dtype=jnp.float32):
    """One-time (init-time) padding / transpose of the parameters.

    emb_weight: (V, E)  -- nn.Embedding.weight
    out_weight: (V, E)  -- nn.Linear(E, V, bias=False).weight
    Returns:
      emb_p: (V,  Ep) param_dtype  (embedding table, E zero-padded to Ep)
      w2t_p: (Ep, Vp) param_dtype  (pre-transposed, zero-padded output weights)
    Zero padding keeps padded columns contributing 0 to every dot product.
    param_dtype=jnp.bfloat16 halves the W2 HBM stream (relax the 1e-5 check).
    """
    V, E = emb_weight.shape
    Vp, Ep, _ = _padded_vocab_dims(V, E)
    emb_p = (jnp.zeros((V, Ep), param_dtype)
             .at[:, :E].set(emb_weight.astype(param_dtype)))
    w2t_p = (jnp.zeros((Ep, Vp), param_dtype)
             .at[:E, :V].set(out_weight.T.astype(param_dtype)))
    return emb_p, w2t_p


def _skipgram_kernel(hid_ref, w2t_ref, out_ref):
    # hid_ref : (TM, Ep) tile of the gathered hidden activations.
    # w2t_ref : (Ep, TN) vocab tile of hidden_to_output.weight^T; its block
    #           index is constant across the inner (sample) grid axis, so the
    #           tile stays VMEM-resident while the M tiles stream by.
    # out_ref : (TM, TN) lane-dense output tile (unmasked stores).
    out_ref[...] = jnp.dot(hid_ref[...], w2t_ref[...],
                           preferred_element_type=jnp.float32)


@functools.partial(jax.jit, static_argnames=("voc_size",))
def skipgram_forward(idx, emb_p, w2t_p, voc_size):
    """idx: (N,) int32 word indices. Returns (N, voc_size) float32 logits."""
    idx = jnp.asarray(idx, jnp.int32)
    N = idx.shape[0]
    Ep = emb_p.shape[1]
    Vp = w2t_p.shape[1]
    isize = jnp.dtype(emb_p.dtype).itemsize

    TN = min(_TN_TARGET, Vp)
    TM = min(_TM_TARGET, _round_up(max(N, 1), 8))
    Np = _round_up(N, TM)
    n_vocab_tiles = Vp // TN
    n_m_tiles = Np // TM

    # Embedding lookup (hidden layer), batched into the matmul M dimension.
    # Padded rows are zeros and are sliced off below.
    hidden = jnp.take(emb_p, idx, axis=0)                       # (N, Ep)
    hidden_p = jnp.zeros((Np, Ep), emb_p.dtype).at[:N].set(hidden)

    # Honest HBM traffic for this grid order: W2 streamed once total,
    # hidden tiles re-read once per vocab tile, output written once.
    bytes_accessed = (Ep * Vp * isize
                      + Np * Ep * isize * n_vocab_tiles
                      + Np * Vp * 4)

    # Double-buffered working set; set the scoped-VMEM limit explicitly
    # (v5e default scoped limit is 16 MiB; v7x has 64 MiB physical VMEM).
    working_set = 2 * (TM * Ep * isize + Ep * TN * isize + TM * TN * 4)
    vmem_limit = int(min(max(2 * working_set, 32 << 20), 100 << 20))

    out_padded = pl.pallas_call(
        _skipgram_kernel,
        out_shape=jax.ShapeDtypeStruct((Np, Vp), jnp.float32),
        grid_spec=pltpu.PrefetchScalarGridSpec(
            num_scalar_prefetch=0,
            # Vocab tiles lead (v7x dual-TC shards them across cores);
            # samples are innermost so the W2 tile stays VMEM-resident.
            grid=(n_vocab_tiles, n_m_tiles),
            in_specs=[
                pl.BlockSpec((TM, Ep), lambda j, i: (i, 0)),
                pl.BlockSpec((Ep, TN), lambda j, i: (0, j)),
            ],
            out_specs=pl.BlockSpec((TM, TN), lambda j, i: (i, j)),
        ),
        compiler_params=pltpu.CompilerParams(
            dimension_semantics=("parallel", "arbitrary"),
            vmem_limit_bytes=vmem_limit),
        cost_estimate=pl.CostEstimate(
            flops=2 * Np * Ep * Vp,
            transcendentals=0,
            bytes_accessed=int(bytes_accessed)),
    )(hidden_p, w2t_p)

    # Strip padding. At real (N, V) this extra pass can be avoided by
    # returning the padded slab to the consumer.
    return out_padded[:N, :voc_size]


if __name__ == "__main__":
    # Recreate the toy vocabulary from the PyTorch script (sorted for determinism).
    sentences = ['Kage is Teacher', 'Mazong is Boss', 'Niuzong is Boss',
                 'Xiaobing is Student', 'Xiaoxue is Student']
    words = ' '.join(sentences).split()
    word_list = sorted(set(words))
    word_to_idx = {w: i for i, w in enumerate(word_list)}

    voc_size = len(word_list)        # 9
    embedding_size = 2

    key = jax.random.PRNGKey(0)
    k_emb, k_out, k_idx = jax.random.split(key, 3)

    # nn.Embedding default init: N(0, 1).
    emb_weight = jax.random.normal(k_emb, (voc_size, embedding_size), jnp.float32)
    # nn.Linear default init: U(-1/sqrt(in_features), 1/sqrt(in_features)).
    bound = 1.0 / math.sqrt(embedding_size)
    out_weight = jax.random.uniform(k_out, (voc_size, embedding_size),
                                    jnp.float32, -bound, bound)

    # Target-word indices (the module's X; spec uses a single index, a small
    # batch exercises the same path).
    N = 4
    idx = jax.random.randint(k_idx, (N,), 0, voc_size, dtype=jnp.int32)

    # One-time parameter prep (pad/transpose hoisted out of the forward path).
    emb_p, w2t_p = prepare_skipgram_params(emb_weight, out_weight)

    out = skipgram_forward(idx, emb_p, w2t_p, voc_size)
    out = jax.block_until_ready(out)

    # Pure-JAX reference of the exact PyTorch forward.
    hidden_ref = emb_weight[idx]              # Embedding lookup   (N, E)
    out_ref = hidden_ref @ out_weight.T       # Linear, no bias    (N, V)

    assert out.shape == (N, voc_size)
    assert jnp.allclose(out, out_ref, atol=1e-5, rtol=1e-5)
    print("KERNEL_OK")
</pallas_src>

<mosaic_0001>
module attributes {stable_mosaic.version = 11 : i64} {
  func.func @_skipgram_kernel(%arg0: i32, %arg1: i32, %arg2: memref<8x128xf32, #tpu.memory_space<vmem>>, %arg3: memref<128x128xf32, #tpu.memory_space<vmem>>, %arg4: memref<8x128xf32, #tpu.memory_space<vmem>>) attributes {dimension_semantics = [#tpu.dimension_semantics<parallel>, #tpu.dimension_semantics<arbitrary>], iteration_bounds = array<i64: 1, 1>, scalar_prefetch = 0 : i64, scratch_operands = 0 : i64, tpu.core_type = #tpu.core_type<tc>, window_params = [{transform_indices = @transform_0, window_bounds = array<i64: 8, 128>}, {transform_indices = @transform_1, window_bounds = array<i64: 128, 128>}, {transform_indices = @transform_2, window_bounds = array<i64: 8, 128>}]} {
    %c0 = arith.constant 0 : index
    %c0_0 = arith.constant 0 : index
    %0 = vector.load %arg2[%c0, %c0_0] : memref<8x128xf32, #tpu.memory_space<vmem>>, vector<8x128xf32>
    %c0_1 = arith.constant 0 : index
    %c0_2 = arith.constant 0 : index
    %1 = vector.load %arg3[%c0_1, %c0_2] : memref<128x128xf32, #tpu.memory_space<vmem>>, vector<128x128xf32>
    %cst = arith.constant dense<0.000000e+00> : vector<8x128xf32>
    %2 = tpu.matmul %0, %1, %cst {dimension_numbers = #tpu.dot_dimension_numbers<[1], [0], [0], [1], [0, 0, 1, 1], [], []>} : vector<8x128xf32>, vector<128x128xf32>, vector<8x128xf32> -> vector<8x128xf32>
    %c0_3 = arith.constant 0 : index
    %c0_4 = arith.constant 0 : index
    %3 = vector.load %arg4[%c0_3, %c0_4] : memref<8x128xf32, #tpu.memory_space<vmem>>, vector<8x128xf32>
    tpu.vector_store %arg4[%c0_3, %c0_4], %2 {strides = array<i32>} : memref<8x128xf32, #tpu.memory_space<vmem>>, vector<8x128xf32>,
    return
  }
  func.func @transform_0(%arg0: i32, %arg1: i32) -> (i32, i32) {
    %c0_i32 = arith.constant 0 : i32
    %c0_i32_0 = arith.constant 0 : i32
    return %arg1, %c0_i32 : i32, i32
  }
  func.func @transform_1(%arg0: i32, %arg1: i32) -> (i32, i32) {
    %c0_i32 = arith.constant 0 : i32
    %c0_i32_0 = arith.constant 0 : i32
    return %c0_i32, %arg0 : i32, i32
  }
  func.func @transform_2(%arg0: i32, %arg1: i32) -> (i32, i32) {
    %c0_i32 = arith.constant 0 : i32
    return %arg1, %arg0 : i32, i32
  }
}

</mosaic_0001>

<bundles_post_ra>
// kernel: skipgram_forward.1
= control target key start
LH: loop header
LB: loop body
LE: loop exit
PB: predicated region body
PF: predicated region fallthrough
CT: control target
= control target key end

     0   :  { %7 = vsyncpa [#allocation3], 0  ;;  %s224_s9 = smov [#allocation2]   ;;  %s263_s0 = inlined_call_operand.vmem [shape: f32[8,128], index: 0, kind: input, shape index: {}]   ;;  %s264_s1 = inlined_call_operand.hbm [shape: f32[128,128], index: 1, kind: input, shape index: {}]   ;;  %s265_s2 = inlined_call_operand.vmem [shape: f32[8,128], index: 2, kind: output, shape index: {}]  }
   0x1   :  { %s15_s10 = sshll.u32 %s224_s9, 4  ;;  %s200_s13 = scalar_lea.hbm %s264_s1, 2048  ;;  %s16_s10 = int_to_ptr.vmem [resolvable:$true] %s15_s10 }
   0x2   :  { %p201_p0 = scmp.ne.s32.totalorder %s264_s1, %s200_s13  ;;  %p204_p1 = scmp.lt.u32.totalorder %s200_s13, %s264_s1 }
   0x4   :  { %p206_p2 = pnand %p204_p1, %p201_p0 }
   0x6   :  { %209 = shalt.err (!%p206_p2)
}
   0x7   :  { %s210_s18 = scalar_lea.vmem %s16_s10, 2048  ;;  %p215_p4 = scmp.lt.s32.totalorder %s16_s10, %s16_s10 }
   0x8   :  { %p211_p3 = scmp.ne.s32.totalorder %s16_s10, %s210_s18  ;;  %p216_p5 = scmp.lt.s32.totalorder %s210_s18, %s210_s18 }
   0xa   :  { %p217_p6 = por %p216_p5, %p215_p4 }
   0xc   :  { %p218_p7 = pnand %p217_p6, %p211_p3 }
   0xe   :  { %221 = shalt.err (!%p218_p7)
}
   0xf   :  { %s225_s19 = smov 128   ;;  %s226_s20 = smov 8  }
  0x10   :  { %21 = dma.hbm_to_vmem [thread:$0]  %s264_s1, 2048, %s16_s10, [#allocation3], %s225_s19, %s225_s19, %s226_s20  }
  0x11   :  { %222 = dma.done.wait [#allocation3], 2048  }
  0x12   :  { %223 = vsyncadd [#allocation3], 4294965248  ;;  %v227_v0 = vmov 0.0|0.0   ;;  %vm228_vm0 = vmmov 0   ;;  %v229_v1 = vmov 0.0   ;;  %v26_v2 = vld [vmem:[#allocation2] sm:$0xff] }
  0x13   :  { %170 = vmatprep.subr.bf16.mxu0 %v227_v0  ;;  %167 = vmatprep.mubr.msk.f32.mxu0 %vm228_vm0, %v229_v1  ;;  %v27_v3 = vld [vmem:[#allocation2 + $0x8] sm:$0xff]  ;;  %v28_v4 = vld [vmem:[#allocation2 + $0x10] sm:$0xff]  ;;  %v29_v6 = vld [vmem:[#allocation2 + $0x18] sm:$0xff] }
  0x14   :  { %v171_v5 = vpack.c.bf16 %v27_v3, %v26_v2  ;;  %v174_v7 = vpack.c.bf16 %v29_v6, %v28_v4  ;;  %v30_v8 = vld [vmem:[#allocation2 + $0x20] sm:$0xff]  ;;  %v31_v9 = vld [vmem:[#allocation2 + $0x28] sm:$0xff]  ;;  %v32_v11 = vld [vmem:[#allocation2 + $0x30] sm:$0xff] }
  0x15   :  { %v177_v10 = vpack.c.bf16 %v31_v9, %v30_v8  ;;  %v33_v12 = vld [vmem:[#allocation2 + $0x38] sm:$0xff]  ;;  %v34_v14 = vld [vmem:[#allocation2 + $0x40] sm:$0xff]  ;;  %v35_v15 = vld [vmem:[#allocation2 + $0x48] sm:$0xff] }
  0x16   :  { %172 = vmatpush3.bf16.msra.mxu0 %v171_v5  ;;  %v180_v13 = vpack.c.bf16 %v33_v12, %v32_v11  ;;  %v183_v16 = vpack.c.bf16 %v35_v15, %v34_v14  ;;  %v36_v17 = vld [vmem:[#allocation2 + $0x50] sm:$0xff]  ;;  %v37_v18 = vld [vmem:[#allocation2 + $0x58] sm:$0xff]  ;;  %v38_v20 = vld [vmem:[#allocation2 + $0x60] sm:$0xff] }
  0x17   :  { %173 = vmatprep.subr.bf16.mxu0 %v227_v0  ;;  %v186_v19 = vpack.c.bf16 %v37_v18, %v36_v17  ;;  %v39_v21 = vld [vmem:[#allocation2 + $0x68] sm:$0xff]  ;;  %v40_v23 = vld [vmem:[#allocation2 + $0x70] sm:$0xff]  ;;  %v41_v24 = vld [vmem:[#allocation2 + $0x78] sm:$0xff] }
  0x18   :  { %v189_v22 = vpack.c.bf16 %v39_v21, %v38_v20  ;;  %v192_v25 = vpack.c.bf16 %v41_v24, %v40_v23  ;;  %v25_v26 = vld [vmem:[%s263_s0] sm:$0xff] }
  0x1a   :  { %175 = vmatpush3.bf16.msra.mxu0 %v174_v7 }
  0x1b   :  { %176 = vmatprep.subr.bf16.mxu0 %v227_v0 }
  0x1e   :  { %178 = vmatpush3.bf16.msra.mxu0 %v177_v10 }
  0x1f   :  { %179 = vmatprep.subr.bf16.mxu0 %v227_v0 }
  0x22   :  { %181 = vmatpush3.bf16.msra.mxu0 %v180_v13 }
  0x23   :  { %182 = vmatprep.subr.bf16.mxu0 %v227_v0 }
  0x26   :  { %184 = vmatpush3.bf16.msra.mxu0 %v183_v16 }
  0x27   :  { %185 = vmatprep.subr.bf16.mxu0 %v227_v0 }
  0x2a   :  { %187 = vmatpush3.bf16.msra.mxu0 %v186_v19 }
  0x2b   :  { %188 = vmatprep.subr.bf16.mxu0 %v227_v0 }
  0x2e   :  { %190 = vmatpush3.bf16.msra.mxu0 %v189_v22 }
  0x2f   :  { %191 = vmatprep.subr.bf16.mxu0 %v227_v0 }
  0x32   :  { %193 = vmatpush3.bf16.msra.mxu0 %v192_v25 }
  0x35   :  { %168 = vmatmul.mubr.f32.vlgmr.msra.gmra.mrb[0].mxu0 %v25_v26 }
 0x108   :  { %v108_v27 = vpop.f32.mrb[0].mxu0 }
 0x109   :  { %112 = vst [vmem:[%s265_s2] sm:$0xff] %v108_v27  ;;  %v169_v28 = vpop.f32.mrb[1].mxu0 }
 0x10a   :  { %117 = vsyncpa [#allocation3], 1 }

</bundles_post_ra>
